<compile_context>
chip_gen: v7x
topology: tpu7x:2x2x1
jax: 0.10.0
libtpu: 0.0.40
codegen_flags: <defaults>
</compile_context>

<pallas_src>
import numpy as np
import jax
import jax.numpy as jnp
from jax.experimental import pallas as pl
from jax.experimental.pallas import tpu as pltpu


# ----------------------------- Pallas kernel -------------------------------

def mlp_sigmoid_kernel(feat_ref, w1_ref, b1_ref, w2_ref, b2_ref, w3_ref, b3_ref,
                       out_ref):
    """Per-edge MLP: Linear -> ReLU -> Linear -> ReLU -> Linear -> sigmoid.

    Edge-on-lane layout:
      feat_ref : [F, tile_e]   (tile_e edges on the lane axis)
      w1_ref   : [H, F]        b1_ref : [H, 1]
      w2_ref   : [H, H]        b2_ref : [H, 1]
      w3_ref   : [H, 1]        b3_ref : [1, 1]
      out_ref  : [1, tile_e]   (lane-dense sigmoid weights)
    """
    h = jnp.dot(w1_ref[...], feat_ref[...],
                preferred_element_type=jnp.float32) + b1_ref[...]
    h = jnp.maximum(h, 0.0)
    h = jnp.dot(w2_ref[...], h,
                preferred_element_type=jnp.float32) + b2_ref[...]
    h = jnp.maximum(h, 0.0)
    # Final H -> 1 projection on the VPU (+ XLU sublane reduce) instead of an
    # N=1 MXU matmul; the result is already lane-dense.
    o = jnp.sum(h * w3_ref[...], axis=0, keepdims=True) + b3_ref[...]
    out_ref[...] = jax.nn.sigmoid(o)


# ------------------------------- wrapper ------------------------------------

def gaussian_edge_weight_forward(x, edge_index, full_right_idx, params,
                                 in_channels, d, tile_e=512):
    row, col = edge_index[0], edge_index[1]
    cd = in_channels * d

    # --- glue: gather / concat / reshape (mirrors the torch code exactly) ---
    x_mu = x[:, :cd]
    x_sig = x[:, cd:]
    x_cat = jnp.concatenate([jnp.take(x_mu, row, axis=0),
                             jnp.take(x_mu, col, axis=0)], axis=-1)
    x_cat = x_cat.reshape(-1, 2 * cd)
    x_sig_cat = jnp.concatenate([jnp.take(x_sig, row, axis=0),
                                 jnp.take(x_sig, col, axis=0)], axis=-1)
    x_sig_cat = x_sig_cat.reshape(-1, d, 2 * cd).sum(axis=1)
    feat = jnp.concatenate([x_cat, x_sig_cat], axis=1)            # [E, 4*cd]

    E, F = feat.shape
    H = params["w1"].shape[1]

    # Edge axis on lanes: pad E to a multiple of 128 and tile by tile_e.
    tile_e = max(128, min(int(tile_e), ((E + 127) // 128) * 128))
    tile_e = (tile_e // 128) * 128
    Ep = ((E + tile_e - 1) // tile_e) * tile_e
    feat_t = jnp.pad(feat, ((0, Ep - E), (0, 0))).T               # [F, Ep]

    # Transposed parameters (tiny one-off ops).
    w1t = params["w1"].T                                          # [H, F]
    b1t = params["b1"].T                                          # [H, 1]
    w2t = params["w2"].T                                          # [H, H]
    b2t = params["b2"].T                                          # [H, 1]
    w3 = params["w3"]                                             # [H, 1]
    b3 = params["b3"]                                             # [1, 1]

    grid = (Ep // tile_e,)

    # --- hot path: per-edge MLP + sigmoid, lane-dense output ---
    w_lanes = pl.pallas_call(
        mlp_sigmoid_kernel,
        out_shape=jax.ShapeDtypeStruct((1, Ep), jnp.float32),
        grid=grid,
        in_specs=[
            pl.BlockSpec((F, tile_e), lambda i: (0, i)),          # edge features
            pl.BlockSpec((H, F), lambda i: (0, 0)),               # W1^T (grid-invariant)
            pl.BlockSpec((H, 1), lambda i: (0, 0)),               # b1^T
            pl.BlockSpec((H, H), lambda i: (0, 0)),               # W2^T
            pl.BlockSpec((H, 1), lambda i: (0, 0)),               # b2^T
            pl.BlockSpec((H, 1), lambda i: (0, 0)),               # w3 column
            pl.BlockSpec((1, 1), lambda i: (0, 0)),               # b3
        ],
        out_specs=pl.BlockSpec((1, tile_e), lambda i: (0, i)),
        compiler_params=pltpu.CompilerParams(
            dimension_semantics=("parallel",)),
    )(feat_t, w1t, b1t, w2t, b2t, w3, b3)

    # Reverse-edge pair product: tiny data-dependent gather + elementwise mul;
    # a dedicated Pallas call here is pure overhead, so let XLA fuse it.
    w = w_lanes[0, :E].reshape(E, 1)
    return w * jnp.take(w, full_right_idx, axis=0)


# ------------------------------ reference -----------------------------------

def reference_forward(x, edge_index, full_right_idx, params, in_channels, d):
    row, col = edge_index[0], edge_index[1]
    cd = in_channels * d
    x_mu, x_sig = x[:, :cd], x[:, cd:]
    x_cat = jnp.concatenate(
        [jnp.take(x_mu, row, 0), jnp.take(x_mu, col, 0)], -1).reshape(-1, 2 * cd)
    x_sig_cat = jnp.concatenate(
        [jnp.take(x_sig, row, 0), jnp.take(x_sig, col, 0)], -1)
    x_sig_cat = x_sig_cat.reshape(-1, d, 2 * cd).sum(axis=1)
    feat = jnp.concatenate([x_cat, x_sig_cat], axis=1)
    h = jnp.maximum(feat @ params["w1"] + params["b1"], 0.0)
    h = jnp.maximum(h @ params["w2"] + params["b2"], 0.0)
    w = jax.nn.sigmoid(h @ params["w3"] + params["b3"])
    return w * jnp.take(w, full_right_idx, axis=0)


# -------------------------------- main ---------------------------------------

if __name__ == "__main__":
    in_channels = 4
    d = 2
    hidden = 32                            # rest_maps_mlp = (2, 32)
    N = 128                                # nodes
    feat_dim = in_channels * d * (1 + d)   # mu (in*d) + sigma (in*d*d) = 24
    F_in = 4 * in_channels * d             # MLP input width = 32

    # symmetric ring graph (both directions) -> E = 2*N = 256 edges
    src = np.arange(N)
    dst = (np.arange(N) + 1) % N
    rows = np.concatenate([src, dst])
    cols = np.concatenate([dst, src])
    E = rows.shape[0]
    edge_index = jnp.asarray(np.stack([rows, cols]), dtype=jnp.int32)

    # full_right_idx[e] = index of the reverse edge (col[e], row[e])
    lut = {(int(r), int(c)): i for i, (r, c) in enumerate(zip(rows, cols))}
    full_right_idx = jnp.asarray(
        np.array([lut[(int(c), int(r))] for r, c in zip(rows, cols)],
                 dtype=np.int32))

    # deterministic parameters (same shapes as the torch nn.Linear layers,
    # stored transposed so y = x @ W + b)
    key = jax.random.PRNGKey(0)
    kx, k1, k2, k3, k4, k5, k6 = jax.random.split(key, 7)
    params = {
        "w1": jax.random.normal(k1, (F_in, hidden), jnp.float32) * 0.2,
        "b1": jax.random.normal(k2, (1, hidden), jnp.float32) * 0.1,
        "w2": jax.random.normal(k3, (hidden, hidden), jnp.float32) * 0.2,
        "b2": jax.random.normal(k4, (1, hidden), jnp.float32) * 0.1,
        "w3": jax.random.normal(k5, (hidden, 1), jnp.float32) * 0.2,
        "b3": jax.random.normal(k6, (1, 1), jnp.float32) * 0.1,
    }

    x = jax.random.normal(kx, (N, feat_dim), jnp.float32)

    # tile_e=128 here so the (small) example exercises a multi-step parallel
    # grid; real workloads use the default tile_e=512.
    out = gaussian_edge_weight_forward(x, edge_index, full_right_idx, params,
                                       in_channels, d, tile_e=128)
    out = jax.block_until_ready(out)

    ref = reference_forward(x, edge_index, full_right_idx, params,
                            in_channels, d)
    np.testing.assert_allclose(np.asarray(out), np.asarray(ref),
                               rtol=1e-5, atol=1e-5)
    assert out.shape == (E, 1)
    print("KERNEL_OK")
</pallas_src>

<mosaic_0001>
module attributes {stable_mosaic.version = 11 : i64} {
  func.func @mlp_sigmoid_kernel(%arg0: i32, %arg1: memref<32x128xf32, #tpu.memory_space<vmem>>, %arg2: memref<32x32xf32, #tpu.memory_space<vmem>>, %arg3: memref<32x1xf32, #tpu.memory_space<vmem>>, %arg4: memref<32x32xf32, #tpu.memory_space<vmem>>, %arg5: memref<32x1xf32, #tpu.memory_space<vmem>>, %arg6: memref<32x1xf32, #tpu.memory_space<vmem>>, %arg7: memref<1x1xf32, #tpu.memory_space<vmem>>, %arg8: memref<1x128xf32, #tpu.memory_space<vmem>>) attributes {dimension_semantics = [#tpu.dimension_semantics<parallel>], iteration_bounds = array<i64: 2>, scalar_prefetch = 0 : i64, scratch_operands = 0 : i64, tpu.core_type = #tpu.core_type<tc>, window_params = [{transform_indices = @transform_0, window_bounds = array<i64: 32, 128>}, {pipeline_mode = #tpu.pipeline_mode<synchronous>, transform_indices = @transform_1, window_bounds = array<i64: 32, 32>}, {pipeline_mode = #tpu.pipeline_mode<synchronous>, transform_indices = @transform_2, window_bounds = array<i64: 32, 1>}, {pipeline_mode = #tpu.pipeline_mode<synchronous>, transform_indices = @transform_3, window_bounds = array<i64: 32, 32>}, {pipeline_mode = #tpu.pipeline_mode<synchronous>, transform_indices = @transform_4, window_bounds = array<i64: 32, 1>}, {pipeline_mode = #tpu.pipeline_mode<synchronous>, transform_indices = @transform_5, window_bounds = array<i64: 32, 1>}, {pipeline_mode = #tpu.pipeline_mode<synchronous>, transform_indices = @transform_6, window_bounds = array<i64: 1, 1>}, {transform_indices = @transform_7, window_bounds = array<i64: 1, 128>}]} {
    %c0 = arith.constant 0 : index
    %c0_0 = arith.constant 0 : index
    %0 = vector.load %arg2[%c0, %c0_0] : memref<32x32xf32, #tpu.memory_space<vmem>>, vector<32x32xf32>
    %c0_1 = arith.constant 0 : index
    %c0_2 = arith.constant 0 : index
    %1 = vector.load %arg1[%c0_1, %c0_2] : memref<32x128xf32, #tpu.memory_space<vmem>>, vector<32x128xf32>
    %cst = arith.constant dense<0.000000e+00> : vector<32x128xf32>
    %2 = tpu.matmul %0, %1, %cst {dimension_numbers = #tpu.dot_dimension_numbers<[1], [0], [0], [1], [0, 0, 1, 1], [], []>} : vector<32x32xf32>, vector<32x128xf32>, vector<32x128xf32> -> vector<32x128xf32>
    %c0_3 = arith.constant 0 : index
    %c0_4 = arith.constant 0 : index
    %3 = vector.load %arg3[%c0_3, %c0_4] : memref<32x1xf32, #tpu.memory_space<vmem>>, vector<32x1xf32>
    %4 = vector.broadcast %3 : vector<32x1xf32> to vector<32x128xf32>
    %5 = arith.addf %2, %4 : vector<32x128xf32>
    %cst_5 = arith.constant 0.000000e+00 : f32
    %6 = vector.broadcast %cst_5 : f32 to vector<32x128xf32>
    %7 = arith.maximumf %5, %6 : vector<32x128xf32>
    %c0_6 = arith.constant 0 : index
    %c0_7 = arith.constant 0 : index
    %8 = vector.load %arg4[%c0_6, %c0_7] : memref<32x32xf32, #tpu.memory_space<vmem>>, vector<32x32xf32>
    %cst_8 = arith.constant dense<0.000000e+00> : vector<32x128xf32>
    %9 = tpu.matmul %8, %7, %cst_8 {dimension_numbers = #tpu.dot_dimension_numbers<[1], [0], [0], [1], [0, 0, 1, 1], [], []>} : vector<32x32xf32>, vector<32x128xf32>, vector<32x128xf32> -> vector<32x128xf32>
    %c0_9 = arith.constant 0 : index
    %c0_10 = arith.constant 0 : index
    %10 = vector.load %arg5[%c0_9, %c0_10] : memref<32x1xf32, #tpu.memory_space<vmem>>, vector<32x1xf32>
    %11 = vector.broadcast %10 : vector<32x1xf32> to vector<32x128xf32>
    %12 = arith.addf %9, %11 : vector<32x128xf32>
    %cst_11 = arith.constant 0.000000e+00 : f32
    %13 = vector.broadcast %cst_11 : f32 to vector<32x128xf32>
    %14 = arith.maximumf %12, %13 : vector<32x128xf32>
    %c0_12 = arith.constant 0 : index
    %c0_13 = arith.constant 0 : index
    %15 = vector.load %arg6[%c0_12, %c0_13] : memref<32x1xf32, #tpu.memory_space<vmem>>, vector<32x1xf32>
    %16 = vector.broadcast %15 : vector<32x1xf32> to vector<32x128xf32>
    %17 = arith.mulf %14, %16 : vector<32x128xf32>
    %cst_14 = arith.constant dense<0.000000e+00> : vector<128xf32>
    %18 = vector.multi_reduction <add>, %17, %cst_14 [0] : vector<32x128xf32> to vector<128xf32>
    %19 = vector.shape_cast %18 : vector<128xf32> to vector<1x128xf32>
    %c0_15 = arith.constant 0 : index
    %c0_16 = arith.constant 0 : index
    %20 = vector.load %arg7[%c0_15, %c0_16] : memref<1x1xf32, #tpu.memory_space<vmem>>, vector<1x1xf32>
    %21 = vector.broadcast %20 : vector<1x1xf32> to vector<1x128xf32>
    %22 = arith.addf %19, %21 : vector<1x128xf32>
    %23 = arith.negf %22 : vector<1x128xf32>
    %24 = math.exp %23 : vector<1x128xf32>
    %cst_17 = arith.constant 1.000000e+00 : f32
    %25 = vector.broadcast %cst_17 : f32 to vector<1x128xf32>
    %26 = arith.addf %25, %24 : vector<1x128xf32>
    %27 = arith.divf %25, %26 : vector<1x128xf32>
    %c0_18 = arith.constant 0 : index
    %c0_19 = arith.constant 0 : index
    %28 = vector.load %arg8[%c0_18, %c0_19] : memref<1x128xf32, #tpu.memory_space<vmem>>, vector<1x128xf32>
    tpu.vector_store %arg8[%c0_18, %c0_19], %27 {strides = array<i32>} : memref<1x128xf32, #tpu.memory_space<vmem>>, vector<1x128xf32>,
    return
  }
  func.func @transform_0(%arg0: i32) -> (i32, i32) {
    %c0_i32 = arith.constant 0 : i32
    %c0_i32_0 = arith.constant 0 : i32
    return %c0_i32, %arg0 : i32, i32
  }
  func.func @transform_1(%arg0: i32) -> (i32, i32) {
    %c0_i32 = arith.constant 0 : i32
    %c0_i32_0 = arith.constant 0 : i32
    %c0_i32_1 = arith.constant 0 : i32
    return %c0_i32, %c0_i32_0 : i32, i32
  }
  func.func @transform_2(%arg0: i32) -> (i32, i32) {
    %c0_i32 = arith.constant 0 : i32
    %c0_i32_0 = arith.constant 0 : i32
    %c0_i32_1 = arith.constant 0 : i32
    return %c0_i32, %c0_i32_0 : i32, i32
  }
  func.func @transform_3(%arg0: i32) -> (i32, i32) {
    %c0_i32 = arith.constant 0 : i32
    %c0_i32_0 = arith.constant 0 : i32
    %c0_i32_1 = arith.constant 0 : i32
    return %c0_i32, %c0_i32_0 : i32, i32
  }
  func.func @transform_4(%arg0: i32) -> (i32, i32) {
    %c0_i32 = arith.constant 0 : i32
    %c0_i32_0 = arith.constant 0 : i32
    %c0_i32_1 = arith.constant 0 : i32
    return %c0_i32, %c0_i32_0 : i32, i32
  }
  func.func @transform_5(%arg0: i32) -> (i32, i32) {
    %c0_i32 = arith.constant 0 : i32
    %c0_i32_0 = arith.constant 0 : i32
    %c0_i32_1 = arith.constant 0 : i32
    return %c0_i32, %c0_i32_0 : i32, i32
  }
  func.func @transform_6(%arg0: i32) -> (i32, i32) {
    %c0_i32 = arith.constant 0 : i32
    %c0_i32_0 = arith.constant 0 : i32
    %c0_i32_1 = arith.constant 0 : i32
    return %c0_i32, %c0_i32_0 : i32, i32
  }
  func.func @transform_7(%arg0: i32) -> (i32, i32) {
    %c0_i32 = arith.constant 0 : i32
    %c0_i32_0 = arith.constant 0 : i32
    return %c0_i32, %arg0 : i32, i32
  }
}

</mosaic_0001>

<bundles_post_ra>
// kernel: tpu_custom_call.1
= control target key start
LH: loop header
LB: loop body
LE: loop exit
PB: predicated region body
PF: predicated region fallthrough
CT: control target
= control target key end

     0   :  { %s1234_s0 = inlined_call_operand.vmem [shape: f32[32,256], index: 0, kind: input, shape index: {}]   ;;  %s1235_s1 = inlined_call_operand.vmem [shape: f32[32,32], index: 1, kind: input, shape index: {}]   ;;  %s1236_s2 = inlined_call_operand.vmem [shape: f32[32,1], index: 2, kind: input, shape index: {}]   ;;  %s1237_s3 = inlined_call_operand.hbm [shape: f32[32,32], index: 3, kind: input, shape index: {}]   ;;  %s1238_s4 = inlined_call_operand.vmem [shape: f32[32,1], index: 4, kind: input, shape index: {}]   ;;  %s1239_s5 = inlined_call_operand.vmem [shape: f32[32,1], index: 5, kind: input, shape index: {}]   ;;  %s1240_s6 = inlined_call_operand.<no memory space> [shape: f32[1,1], index: 6, kind: input, shape index: {}]   ;;  %s1241_s7 = inlined_call_operand.hbm [shape: f32[1,256], index: 7, kind: output, shape index: {}]  }
   0x1   :  { %v12_v0 = vstv %s1240_s6 }
   0x2   :  { %13 = vst [vmem:[#allocation2] sm:$0x1] %v12_v0 }
   0x3   :  { %14 = vsyncpa [#allocation5], 0 }
   0x4   :  { %15 = vsyncpa [#allocation6], 0 }
   0x5   :  { %17 = vsyncpa [#allocation6 + $0x1], 0  ;;  %s1027_s26 = smov 0   ;;  %s1029_s27 = smov 0  }
   0x6   :  { %s1031_s28 = smov 0   ;;  %s1033_s29 = smov 0  }
   0x7 LB: > { %s1048_s6 = sadd.s32 4294967295, %s977_s29   ;;  %s743_s30 = sadd.s32 4294967294, %s977_s29   ;;  %s977_s29 = sphi %s1033_s29, %s1259_s29   ;;  %s973_s28 = sphi %s1031_s28, %s1258_s28   ;;  %s969_s27 = sphi %s1029_s27, %s1257_s27   ;;  %s965_s26 = sphi %s1027_s26, %s1256_s26  }
   0x8   : > { %s1052_s8 = sadd.s32 1, %s977_s29   ;;  %s30_s9 = sadd.s32 1, %s973_s28 }
   0x9   : > { %s27_s10 = ssub.s32 %s977_s29, %s1052_s8  ;;  %p37_p0 = scmp.ne.s32.totalorder %s973_s28, %s969_s27 }
   0xa   : > { %p28_p1 = scmp.eq.s32.totalorder %s27_s10, 0  ;;  %p38_p2 = scmp.eq.s32.totalorder %s977_s29, 0 }
   0xb   : > { %p193_p3 = scmp.eq.s32.totalorder %s1048_s6, 1  ;;  %p198_p4 = scmp.ne.s32.totalorder %s969_s27, %s965_s26 }
   0xc   : > { %s1064_s11 = scalar_select %p28_p1, %s973_s28, %s30_s9  }
   0xd   : > { %p1066_p5 = por %p38_p2, %p37_p0  ;;  %p1070_p6 = por %p193_p3, %p37_p0 }
   0xe   : > { %p199_p7 = scmp.eq.s32.totalorder %s743_s30, 1  ;;  %p744_p8 = scmp.ge.s32.totalorder %s977_s29, 1 }
   0xf   : > { %s1245_s12 = scalar_select %p1066_p5, 1, 0 }
  0x10   : > { %s1246_s13 = scalar_select %p1070_p6, 1, 0 }
  0x11   : > { %p206_p9 = scmp.lt.s32.totalorder %s977_s29, 3  ;;  %p1076_p10 = por %p199_p7, %p198_p4 }
  0x12   : > { %p1242_p11 = scmp.eq.s32.totalorder %s1048_s6, 0  ;;  %s979_s16 = smov [#allocation4]  }
  0x13   : > { %s1247_s14 = scalar_select %p1076_p10, 1, 0 }
  0x14   : > { %p1081_p12 = pnand %p744_p8, %p206_p9  ;;  %s224_s17 = sshll.u32 %s979_s16, 4  ;;  %s225_s17 = int_to_ptr.vmem [resolvable:$true] %s224_s17 }
  0x15   : > { %s883_s21 = scalar_lea.hbm %s1237_s3, 512 }
  0x16   : > { %s1248_s15 = scalar_select %p1081_p12, 1, 0 }
  0x17   : > { %p830_p13 = pneg %p1081_p12  ;;  %p884_p1 = scmp.ne.s32.totalorder %s1237_s3, %s883_s21 }
  0x18   : > { %p890_p7 = scmp.lt.u32.totalorder %s883_s21, %s1237_s3 }
  0x19   : > { %p1089_p0 = pnand %p1242_p11, %p830_p13 }
  0x1b   : > { %p885_p2 = pneg %p1089_p0 }
  0x1d   : > { %p886_p3 = pnand %p885_p2, %p884_p1 }
  0x1f   : > { %p887_p4 = pneg %p886_p3 }
  0x21   : > { %p892_p8 = pnand %p890_p7, %p887_p4 }
  0x23   : > { %895 = shalt.err (!%p892_p8)
}
  0x24   : > { %s896_s30 = scalar_lea.vmem %s225_s17, 512  ;;  %p904_p10 = scmp.lt.s32.totalorder %s225_s17, %s225_s17 }
  0x25   : > { %p897_p9 = scmp.ne.s32.totalorder %s225_s17, %s896_s30  ;;  %p905_p6 = scmp.lt.s32.totalorder %s896_s30, %s896_s30 }
  0x27   : > { %p899_p13 = pnand %p897_p9, %p885_p2  ;;  %p906_p12 = por %p905_p6, %p904_p10 }
  0x29   : > { %p900_p11 = pneg %p899_p13 }
  0x2b   : > { %p907_p5 = pnand %p906_p12, %p900_p11 }
  0x2d   : > { %910 = shalt.err (!%p907_p5)
}
  0x2e   : > { %s980_s9 = smov 128   ;;  %s981_s10 = smov 8  }
  0x2f   : > { %833 = dma.hbm_to_vmem [thread:$0]  (!%p1089_p0), %s1237_s3, 512, %s225_s17, [#allocation5], %s980_s9, %s980_s9, %s981_s10  }
  0x30   : > { %p746_p1 = scmp.ge.s32.totalorder %s977_s29, 2 }
  0x31   : > { %p1250_p2 = scmp.ne.s32.totalorder (!%p746_p1), %s1245_s12, 0 }
  0x32   : > { %243 = sbr.rel (%p746_p1) target bundleno = 64 (0x40), region = 40 }
  0x39   : > { %246 = sbr.rel (!%p1250_p2) target bundleno = 64 (0x40), region = 44  ;;  %s248_s20 = sand.u32 (%p1250_p2), 1, %s973_s28  }
  0x3a   : > { %s748_s21 = sshll.u32 (%p1250_p2), %s977_s29, 3  ;;  %s747_s22 = sshll.u32 (%p1250_p2), %s248_s20, 5 }
  0x3b   : > { %s252_s18 = scalar_lea.vmem (%p1250_p2), %s1234_s0, %s748_s21  ;;  %s250_s17 = scalar_lea.vmem (%p1250_p2), [#allocation3], %s747_s22 }
  0x3c   : > { %v286_v1 = vld [vmem:[%s252_s18] sm:$0xff] (%p1250_p2)  ;;  %v288_v2 = vld [vmem:[%s252_s18 + $0x10] sm:$0xff] (%p1250_p2) }
  0x3d   : > { %v290_v3 = vld [vmem:[%s252_s18 + $0x20] sm:$0xff] (%p1250_p2)  ;;  %287 = vst [vmem:[%s250_s17] sm:$0xff] (%p1250_p2), %v286_v1  ;;  %289 = vst [vmem:[%s250_s17 + $0x8] sm:$0xff] (%p1250_p2), %v288_v2  ;;  %v292_v4 = vld [vmem:[%s252_s18 + $0x30] sm:$0xff] (%p1250_p2) }
  0x3e   : > { %291 = vst [vmem:[%s250_s17 + $0x10] sm:$0xff] (%p1250_p2), %v290_v3  ;;  %293 = vst [vmem:[%s250_s17 + $0x18] sm:$0xff] (%p1250_p2), %v292_v4 }
  0x40 PF: > { %p1251_p5 = scmp.ne.s32.totalorder %s1248_s15, 0 }
  0x41   : > { %s1122_s12 = sand.u32 (!%p1251_p5), 1, %s969_s27   ;;  %p1252_p6 = scmp.eq.s32.totalorder (!%p1251_p5), %s1048_s6, 0 }
  0x42   : > { %302 = sbr.rel (%p1251_p5) target bundleno = 593 (0x251), region = 82  ;;  %s750_s25 = sshll.u32 (!%p1251_p5), %s1122_s12, 5 }
  0x43   : > { %s307_s30 = scalar_lea.vmem (!%p1251_p5), [#allocation3], %s750_s25 }
  0x49   : > { %956 = dma.done.wait (%p1252_p6), [#allocation5], 512   ;;  %p1253_p10 = pmov %p1252_p6 }
  0x4a   : > { %v982_v5 = vmov 0   ;;  %vm371_vm0 = vcmask 261120   ;;  %v343_v6 = vld [vmem:[%s307_s30] sm:$0xff]  ;;  %v344_v7 = vld [vmem:[%s307_s30 + $0x8] sm:$0xff]  ;;  %v345_v8 = vld [vmem:[%s307_s30 + $0x10] sm:$0xff]  ;;  %s761_s19 = sshll.u32 %s1048_s6, 4 }
  0x4b   : > { %958 = vsyncadd (%p1253_p10), [#allocation5], 4294966784  ;;  %877 = vset.pattern.permute.xlu0 %v982_v5  ;;  %878 = vset.pattern.permute.xlu1 %v982_v5  ;;  %v808_v9 = vpack.c.bf16 %v344_v7, %v343_v6  ;;  %v346_v10 = vld [vmem:[%s307_s30 + $0x18] sm:$0xff]  ;;  %v349_v14 = vld [vmem:[%s1236_s2 + $0x10] sm:$0xff]  ;;  %s338_s20 = scalar_lea.vmem [#allocation7], %s1122_s12  ;;  %s1190_s24 = scalar_lea.hbm %s1241_s7, %s761_s19 }
  0x4c   : > { %v339_v11 = vld [vmem:[%s1235_s1] sm:$0xff]  ;;  %v812_v12 = vpack.c.bf16 %v346_v10, %v345_v8  ;;  %v348_v15 = vld [vmem:[%s1236_s2 + $0x8] sm:$0xff]  ;;  %363 = vperm.xlu1 %878, %v349_v14   ;;  %v350_v16 = vld [vmem:[%s1236_s2 + $0x18] sm:$0xff]  ;;  %s670_s21 = sshll.u32 %s338_s20, 4  ;;  %s658_s18 = scalar_lea.sflag [#allocation6], %s1122_s12  ;;  %s1192_s21 = int_to_ptr.vmem [resolvable:$true] %s670_s21 }
  0x4d   : > { %788 = vmatprep.mubr.msk.f32.mxu0 %vm371_vm0, %v339_v11  ;;  %v347_v13 = vld [vmem:[%s1236_s2] sm:$0xff]  ;;  %809 = vmatprep.subr.bf16.mxu0 %v808_v9  ;;  %v340_v17 = vld [vmem:[%s1235_s1 + $0x8] sm:$0xff]  ;;  %v341_v19 = vld [vmem:[%s1235_s1 + $0x10] sm:$0xff]  ;;  %s911_s17 = scalar_lea.vmem %s1192_s21, 16  ;;  %p1254_p12 = scmp.ne.s32.totalorder %s1246_s13, 0 }
  0x4e   : > { %353 = vperm.xlu0 %877, %v347_v13   ;;  %811 = vmatpush3.bf16.msra.mxu0 %v808_v9  ;;  %v477_v18 = vld [vmem:[%s1238_s4] sm:$0xff]  ;;  %v478_v20 = vld [vmem:[%s1238_s4 + $0x8] sm:$0xff]  ;;  %v342_v21 = vld [vmem:[%s1235_s1 + $0x18] sm:$0xff]  ;;  %v645_v13 = vlaneseq  ;;  %p912_p11 = scmp.ne.s32.totalorder %s1192_s21, %s911_s17  ;;  %s983_s6 = smov [#allocation7]  }
  0x4f   : > { %813 = vmatprep.subr.bf16.mxu0 %v812_v12  ;;  %v479_v22 = vld [vmem:[%s1238_s4 + $0x10] sm:$0xff]  ;;  %v480_v23 = vld [vmem:[%s1238_s4 + $0x18] sm:$0xff]  ;;  %v602_v24 = vld [vmem:[%s1239_s5] sm:$0xff]  ;;  %s915_s25 = sshll.u32 %s983_s6, 4  ;;  %s916_s25 = int_to_ptr.vmem [resolvable:$false] %s915_s25 }
  0x50   : > { %368 = vperm.xlu1 %878, %v350_v16   ;;  %v603_v25 = vld [vmem:[%s1239_s5 + $0x8] sm:$0xff]  ;;  %v604_v26 = vld [vmem:[%s1239_s5 + $0x10] sm:$0xff]  ;;  %v605_v27 = vld [vmem:[%s1239_s5 + $0x18] sm:$0xff]  ;;  %v646_v16 = vshrl.u32 %v645_v13, 7  ;;  %p913_p0 = pnand %p912_p11, %p1254_p12  ;;  %s917_s30 = scalar_lea.vmem %s916_s25, 32 }
  0x51   : > { %v639_v28 = vld [vmem:[#allocation2] sm:$0x1]  ;;  %v473_v29 = vld [vmem:[#allocation4] sm:$0xff]  ;;  %v474_v48 = vld [vmem:[#allocation4 + $0x8] sm:$0xff]  ;;  %p918_p4 = scmp.lt.s32.totalorder %s1192_s21, %s916_s25  ;;  %p919_p7 = scmp.lt.s32.totalorder %s917_s30, %s911_s17 }
  0x52   : > { %358 = vperm.xlu0 %877, %v348_v15   ;;  %815 = vmatpush3.bf16.msra.mxu0 %v812_v12  ;;  %v475_v49 = vld [vmem:[#allocation4 + $0x10] sm:$0xff]  ;;  %v476_v50 = vld [vmem:[#allocation4 + $0x18] sm:$0xff]  ;;  %p914_p3 = pneg %p913_p0 }
  0x53   : > { %802 = vmatprep.mubr.msk.f32.mxu1 %vm371_vm0, %v473_v29  ;;  %p920_p8 = por %p919_p7, %p918_p4 }
  0x54   : > { %488 = vperm.xlu1 %878, %v478_v20  }
  0x55   : > { %789 = vmatmul.mubr.msk.f32.vlgmr.msra.gmra.mrb[0].mxu0 %vm371_vm0, %v340_v17  ;;  %p921_p9 = pnand %p920_p8, %p914_p3 }
  0x56   : > { %483 = vperm.xlu0 %877, %v477_v18   ;;  %791 = vmatprep.mubr.msk.f32.mxu0 %vm371_vm0, %v341_v19  ;;  %v647_v19 = vsub.s32 0, %v646_v16 }
  0x58   : > { %498 = vperm.xlu1 %878, %v480_v23  }
  0x59   : > { %792 = vmatmul.mubr.msk.f32.gmra.mrb[2].mxu0 %vm371_vm0, %v342_v21 }
  0x5a   : > { %493 = vperm.xlu0 %877, %v479_v22  }
  0x5c   : > { %613 = vperm.xlu1 %878, %v603_v25  }
  0x5e   : > { %608 = vperm.xlu0 %877, %v602_v24  }
  0x60   : > { %623 = vperm.xlu1 %878, %v605_v27  }
  0x62   : > { %618 = vperm.xlu0 %877, %v604_v26  }
  0x66   : > { %642 = vperm.xlu0 %877, %v639_v28  }
  0xcb   : > { %v364_v31 = vpop.permute.xlu1 %363 }
  0xcd   : > { %v354_v30 = vpop.permute.xlu0 %353 }
  0xcf   : > { %v369_v38 = vpop.permute.xlu1 %368 }
  0xd1   : > { %v359_v32 = vpop.permute.xlu0 %358 }
  0xd3   : > { %v489_v52 = vpop.permute.xlu1 %488 }
  0xd5   : > { %v484_v51 = vpop.permute.xlu0 %483 }
  0xd7   : > { %v499_v54 = vpop.permute.xlu1 %498 }
  0xd9   : > { %v494_v53 = vpop.permute.xlu0 %493 }
  0xdb   : > { %v614_v61 = vpop.permute.xlu1 %613 }
  0xdd   : > { %v609_v59 = vpop.permute.xlu0 %608 }
  0xdf   : > { %v624_v10 = vpop.permute.xlu1 %623 }
  0xe1   : > { %v619_v8 = vpop.permute.xlu0 %618 }
  0xe5   : > { %v643_v21 = vpop.permute.xlu0 %642 }
  0xe6   : > { %v648_v23 = vrot.slane %v643_v21, %v647_v19 }
 0x128   : > { %v790_v33 = vpop.f32.mrb[0].mxu0 }
 0x129   : > { %v456_v34 = vadd.f32 %v790_v33, %v359_v32  ;;  %v450_v35 = vpop.f32.mrb[1].mxu0 }
 0x12a   : > { %v451_v36 = vadd.f32 %v450_v35, %v354_v30 }
 0x12b   : > { %v470_v37 = vmax.f32 %v456_v34, 0.0 }
 0x12c   : > { %v469_v39 = vmax.f32 %v451_v36, 0.0  ;;  %v793_v40 = vpop.f32.mrb[2].mxu0 }
 0x12d   : > { %v466_v41 = vadd.f32 %v793_v40, %v369_v38  ;;  %v460_v42 = vpop.f32.mrb[3].mxu0 }
 0x12e   : > { %v461_v43 = vadd.f32 %v460_v42, %v364_v31  ;;  %v816_v44 = vpack.c.bf16 %v470_v37, %v469_v39 }
 0x12f   : > { %v472_v45 = vmax.f32 %v466_v41, 0.0 }
 0x130   : > { %v471_v46 = vmax.f32 %v461_v43, 0.0  ;;  %817 = vmatprep.subr.bf16.mxu1 %v816_v44 }
 0x131   : > { %819 = vmatpush3.bf16.msra.mxu1 %v816_v44 }
 0x132   : > { %v820_v47 = vpack.c.bf16 %v472_v45, %v471_v46 }
 0x134   : > { %821 = vmatprep.subr.bf16.mxu1 %v820_v47 }
 0x135   : > { %823 = vmatpush3.bf16.msra.mxu1 %v820_v47 }
 0x138   : > { %803 = vmatmul.mubr.msk.f32.vlgmr.msra.gmra.mrb[0].mxu1 %vm371_vm0, %v474_v48 }
 0x139   : > { %805 = vmatprep.mubr.msk.f32.mxu1 %vm371_vm0, %v475_v49 }
 0x13c   : > { %806 = vmatmul.mubr.msk.f32.gmra.mrb[2].mxu1 %vm371_vm0, %v476_v50 }
 0x20b   : > { %v804_v55 = vpop.f32.mrb[0].mxu1 }
 0x20c   : > { %v585_v56 = vadd.f32 %v804_v55, %v489_v52  ;;  %v579_v57 = vpop.f32.mrb[1].mxu1 }
 0x20d   : > { %v580_v58 = vadd.f32 %v579_v57, %v484_v51 }
 0x20e   : > { %v599_v60 = vmax.f32 %v585_v56, 0.0 }
 0x20f   : > { %v598_v62 = vmax.f32 %v580_v58, 0.0  ;;  %v807_v63 = vpop.f32.mrb[2].mxu1 }
 0x210   : > { %v627_v0 = vmul.f32 %v614_v61, %v599_v60  ;;  %v595_v1 = vadd.f32 %v807_v63, %v499_v54  ;;  %v589_v2 = vpop.f32.mrb[3].mxu1 }
 0x211   : > { %v626_v3 = vmul.f32 %v609_v59, %v598_v62  ;;  %v590_v4 = vadd.f32 %v589_v2, %v494_v53 }
 0x212   : > { %v601_v6 = vmax.f32 %v595_v1, 0.0 }
 0x213   : > { %v630_v5 = vadd.f32 %v627_v0, %v626_v3  ;;  %v600_v7 = vmax.f32 %v590_v4, 0.0 }
 0x214   : > { %v629_v11 = vmul.f32 %v624_v10, %v601_v6 }
 0x215   : > { %v628_v9 = vmul.f32 %v619_v8, %v600_v7 }
 0x217   : > { %v631_v12 = vadd.f32 %v630_v5, %v628_v9 }
 0x219   : > { %v632_v14 = vadd.f32 %v631_v12, %v629_v11 }
 0x21b   : > { %v633_v15 = vrot.slane %v632_v14, 4 }
 0x21d   : > { %v634_v17 = vadd.f32 %v633_v15, %v632_v14 }
 0x21f   : > { %v635_v18 = vrot.slane %v634_v17, 2 }
 0x221   : > { %v636_v20 = vadd.f32 %v635_v18, %v634_v17 }
 0x223   : > { %v637_v22 = vrot.slane %v636_v20, 1 }
 0x225   : > { %v638_v24 = vadd.f32 %v637_v22, %v636_v20 }
 0x227   : > { %v649_v25 = vadd.f32 %v648_v23, %v638_v24 }
 0x229   : > { %v760_v26 = vmul.f32 -1.442695, %v649_v25 }
 0x22b   : > { %879 = vpow2.f32 %v760_v26 }
 0x235   : > { %v880_v27 = vpop.eup %879 }
 0x236   : > { %v653_v28 = vadd.f32 1.0, %v880_v27 }
 0x238   : > { %881 = vrcp.f32 %v653_v28 }
 0x242   : > { %v882_v29 = vpop.eup %881 }
 0x243   : > { %656 = vst [vmem:[%s338_s20] sm:$0x1] %v882_v29 }
 0x244   : > { %924 = shalt.err (!%p921_p9)
}
 0x245   : > { %s925_s12 = scalar_lea.hbm %s1190_s24, 16  ;;  %s929_s10 = scalar_lea.hbm %s1241_s7, 32 }
 0x246   : > { %p926_p13 = scmp.ne.s32.totalorder %s1190_s24, %s925_s12  ;;  %p930_p6 = scmp.lt.u32.totalorder %s1190_s24, %s1241_s7 }
 0x247   : > { %p931_p10 = scmp.lt.u32.totalorder %s929_s10, %s925_s12  ;;  %p933_p0 = scmp.lt.u32.totalorder %s925_s12, %s1190_s24 }
 0x248   : > { %p927_p2 = pnand %p926_p13, %p1254_p12 }
 0x249   : > { %p932_p11 = por %p931_p10, %p930_p6 }
 0x24a   : > { %p928_p5 = pneg %p927_p2 }
 0x24b   : > { %p934_p3 = por %p933_p0, %p932_p11 }
 0x24d   : > { %p935_p4 = pnand %p934_p3, %p928_p5 }
 0x24f   : > { %938 = shalt.err (!%p935_p4)
}
 0x250   : > { %828 = dma.vmem_to_hbm [thread:$0]  (%p1254_p12), %s1192_s21, 16, %s1190_s24, %s658_s18  }
 0x251 PF: > { %s682_s20 = sand.u32 1, %s965_s26   ;;  %p1255_p7 = scmp.ne.s32.totalorder %s1247_s14, 0 }
 0x252   : > { %s683_s22 = scalar_lea.sflag [#allocation6], %s682_s20 }
 0x253   : > { %p835_p8 = pnand %p746_p1, %p1255_p7 }
 0x255   : > { %960 = dma.done.wait (!%p835_p8), %s683_s22, 16  }
 0x256   : > { %962 = vsyncadd (!%p835_p8), %s683_s22, 4294967280  ;;  %p20_p9 = scmp.ge.s32.totalorder %s1052_s8, 4   ;;  %s1256_s26 = smov %s969_s27 }
 0x257   : > { %s1257_s27 = smov %s973_s28  ;;  %s1258_s28 = smov %s1064_s11 }
 0x258   : > { %s1259_s29 = smov %s1052_s8  ;;  %22 = sbr.rel (!%p20_p9) target bundleno = 7 (0x7), region = 131 }
 0x25f   :  { %687 = vsyncpa [#allocation5], 1 }
 0x260   :  { %689 = vsyncpa [#allocation5 + $0x1], 1 }
 0x261   :  { %690 = vsyncpa [#allocation6], 1 }
 0x262   :  { %692 = vsyncpa [#allocation6 + $0x1], 1 }

</bundles_post_ra>
